<compile_context>
chip_gen: v7x
topology: tpu7x:2x2x1
jax: 0.10.0
libtpu: 0.0.40
codegen_flags: <defaults>
</compile_context>

<pallas_src>
import functools

import jax
import jax.numpy as jnp
from jax.experimental import pallas as pl
from jax.experimental.pallas import tpu as pltpu

LN_EPS = 1e-5  # nn.LayerNorm default


def _round_up(x, m):
    return (x + m - 1) // m * m


def _vmem_limit_bytes():
    """Per-generation VMEM ceiling (~3/4 of capacity, capped at 100 MiB)."""
    try:
        cap = int(pltpu.get_tpu_info().vmem_capacity_bytes)
    except Exception:  # fall back to the smallest per-TC VMEM (v7x: 64 MiB)
        cap = 64 * 1024 * 1024
    return max(32 * 1024 * 1024, min(cap * 3 // 4, 100 * 1024 * 1024))


def _text_seq_time_kernel(
    text_ref,    # (bm, bk_t)  activations (native dtype)
    seq_ref,     # (bm, bk_s)
    wt_ref,      # (bk_t, De)  text_proj weight chunk (in, out)
    ws_ref,      # (bk_s, De)  seq_proj  weight chunk (in, out)
    params_ref,  # (4,  De)    f32 rows: [b_text, ln_gamma, ln_beta, b_seq]
    out_ref,     # (bm, De)
    acc_t_ref,   # (bm, De)    f32 scratch accumulator (text branch)
    acc_s_ref,   # (bm, De)    f32 scratch accumulator (seq branch)
    *,
    mxu_dtype,
    inv_de,
):
    k = pl.program_id(1)

    @pl.when(k == 0)
    def _init():
        acc_t_ref[...] = jnp.zeros_like(acc_t_ref)
        acc_s_ref[...] = jnp.zeros_like(acc_s_ref)

    xt, wt = text_ref[...], wt_ref[...]
    xs, ws = seq_ref[...], ws_ref[...]
    if mxu_dtype is not None:
        # In-kernel cast: keeps HBM traffic at the native width, MXU at bf16.
        xt = xt.astype(mxu_dtype)
        wt = wt.astype(mxu_dtype)
        xs = xs.astype(mxu_dtype)
        ws = ws.astype(mxu_dtype)

    acc_t_ref[...] += jnp.dot(xt, wt, preferred_element_type=jnp.float32)
    acc_s_ref[...] += jnp.dot(xs, ws, preferred_element_type=jnp.float32)

    @pl.when(k == pl.num_programs(1) - 1)
    def _finalize():
        p = params_ref[...]
        b_text, gamma, beta, b_seq = p[0:1], p[1:2], p[2:3], p[3:4]

        # text branch: bias + fused single-pass LayerNorm (f32 math).
        t = acc_t_ref[...] + b_text
        s1 = jnp.sum(t, axis=-1, keepdims=True)
        s2 = jnp.sum(t * t, axis=-1, keepdims=True)
        mean = s1 * inv_de
        var = jnp.maximum(s2 * inv_de - mean * mean, 0.0)
        t = (t - mean) * jax.lax.rsqrt(var + LN_EPS)
        t = t * gamma + beta

        # seq branch bias + sum.
        out_ref[...] = (acc_s_ref[...] + b_seq + t).astype(out_ref.dtype)


@functools.partial(
    jax.jit,
    static_argnames=("block_b", "out_dtype", "mxu_dtype", "num_k_steps"),
)
def text_seq_time_embedding(
    text_embeds, seq_embeds, w_text, b_text, ln_gamma, ln_beta, w_seq, b_seq,
    *, block_b=512, out_dtype=jnp.bfloat16, mxu_dtype=jnp.bfloat16,
    num_k_steps=None,
):
    B, Dt = text_embeds.shape
    B2, Ds = seq_embeds.shape
    assert B2 == B, "text/seq batch mismatch"
    De = w_text.shape[1]
    assert w_text.shape == (Dt, De) and w_seq.shape == (Ds, De)

    vmem_limit = _vmem_limit_bytes()

    # Stack the four per-channel parameter vectors into one (4, De) f32 block
    # (single BlockSpec / DMA instead of four).
    params = jnp.stack(
        [
            b_text.reshape(De),
            ln_gamma.reshape(De),
            ln_beta.reshape(De),
            b_seq.reshape(De),
        ],
        axis=0,
    ).astype(jnp.float32)

    # ---- batch tile -------------------------------------------------------
    act_itemsize = min(
        jnp.dtype(text_embeds.dtype).itemsize, jnp.dtype(seq_embeds.dtype).itemsize
    )
    row_align = 16 if act_itemsize <= 2 else 8
    bm = min(block_b, _round_up(B, row_align))
    # Cap bm so the two f32 accumulators stay within ~1/4 of the VMEM budget
    # (this is what limits bm on v7x for large De; v5e/v6e keep 512).
    while (
        bm >= 2 * row_align
        and (bm // 2) % row_align == 0
        and 2 * bm * De * 4 > vmem_limit // 4
    ):
        bm //= 2
    grid_b = pl.cdiv(B, bm)

    # ---- contraction (K) tiling -------------------------------------------
    w_itemsize = max(
        jnp.dtype(w_text.dtype).itemsize, jnp.dtype(w_seq.dtype).itemsize
    )

    def _step_weight_bytes(nk_):
        bufs = 1 if nk_ == 1 else 2  # Buffered(1) when grid-invariant
        return (Dt // nk_ + Ds // nk_) * De * w_itemsize * bufs

    if num_k_steps is not None:
        nk = int(num_k_steps)
        assert nk == 1 or (Dt % (nk * 128) == 0 and Ds % (nk * 128) == 0), (
            "num_k_steps must split Dt and Ds into lane-aligned (x128) chunks"
        )
    else:
        nk = 1
        weight_budget = vmem_limit // 3
        while _step_weight_bytes(nk) > weight_budget:
            nk2 = nk * 2
            if Dt % (nk2 * 128) == 0 and Ds % (nk2 * 128) == 0:
                nk = nk2
            else:
                # TODO(synk): mask ragged K tails so embed dims that don't split
                # into 128-aligned power-of-two chunks can still be K-tiled.
                break
    bk_t = Dt // nk
    bk_s = Ds // nk

    # ---- specs -------------------------------------------------------------
    if nk == 1:
        # Grid-invariant weights: single-buffer to halve their VMEM footprint.
        wt_spec = pl.BlockSpec((Dt, De), lambda i, k: (0, 0),
                               pipeline_mode=pl.Buffered(1))
        ws_spec = pl.BlockSpec((Ds, De), lambda i, k: (0, 0),
                               pipeline_mode=pl.Buffered(1))
    else:
        wt_spec = pl.BlockSpec((bk_t, De), lambda i, k: (k, 0))
        ws_spec = pl.BlockSpec((bk_s, De), lambda i, k: (k, 0))

    in_specs = [
        pl.BlockSpec((bm, bk_t), lambda i, k: (i, k)),   # text activations
        pl.BlockSpec((bm, bk_s), lambda i, k: (i, k)),   # seq activations
        wt_spec,
        ws_spec,
        pl.BlockSpec((4, De), lambda i, k: (0, 0),
                     pipeline_mode=pl.Buffered(1)),      # stacked params
    ]
    out_specs = pl.BlockSpec((bm, De), lambda i, k: (i, 0))

    kernel = functools.partial(
        _text_seq_time_kernel, mxu_dtype=mxu_dtype, inv_de=1.0 / De
    )

    out = pl.pallas_call(
        kernel,
        out_shape=jax.ShapeDtypeStruct((B, De), out_dtype),
        grid_spec=pltpu.PrefetchScalarGridSpec(
            num_scalar_prefetch=0,
            grid=(grid_b, nk),
            in_specs=in_specs,
            out_specs=out_specs,
            scratch_shapes=[
                pltpu.VMEM((bm, De), jnp.float32),
                pltpu.VMEM((bm, De), jnp.float32),
            ],
        ),
        compiler_params=pltpu.CompilerParams(
            dimension_semantics=("parallel", "arbitrary"),
            vmem_limit_bytes=vmem_limit,
        ),
    )(text_embeds, seq_embeds, w_text, w_seq, params)

    return out


def _reference(text, seq, w_text, b_text, gamma, beta, w_seq, b_seq):
    """Pure-f32 reference (PyTorch semantics)."""
    De = w_text.shape[1]
    hp = jax.lax.Precision.HIGHEST
    t = jnp.dot(text.astype(jnp.float32), w_text.astype(jnp.float32),
                precision=hp) + b_text.reshape(1, De).astype(jnp.float32)
    mean = jnp.mean(t, axis=-1, keepdims=True)
    var = jnp.mean((t - mean) ** 2, axis=-1, keepdims=True)
    t = (t - mean) * jax.lax.rsqrt(var + LN_EPS)
    t = t * gamma.reshape(1, De) + beta.reshape(1, De)
    s = jnp.dot(seq.astype(jnp.float32), w_seq.astype(jnp.float32),
                precision=hp) + b_seq.reshape(1, De).astype(jnp.float32)
    return s + t


if __name__ == "__main__":
    key = jax.random.PRNGKey(0)
    keys = jax.random.split(key, 6)

    # ---- Case 1: small module-like dims, full-f32 fidelity check ----------
    B, TEXT_DIM, SEQ_DIM, TIME_DIM = 8, 128, 128, 256
    text = jax.random.normal(keys[0], (B, TEXT_DIM), jnp.float32)
    seq = jax.random.normal(keys[1], (B, SEQ_DIM), jnp.float32)
    # Linear weights stored (in_dim, out_dim) == PyTorch weight.T
    w_text = jax.random.normal(keys[2], (TEXT_DIM, TIME_DIM), jnp.float32) * 0.02
    b_text = jax.random.normal(keys[3], (TIME_DIM,), jnp.float32) * 0.02
    w_seq = jax.random.normal(keys[4], (SEQ_DIM, TIME_DIM), jnp.float32) * 0.02
    b_seq = jax.random.normal(keys[5], (TIME_DIM,), jnp.float32) * 0.02
    gamma = jnp.ones((TIME_DIM,), jnp.float32)    # LayerNorm default weight
    beta = jnp.zeros((TIME_DIM,), jnp.float32)    # LayerNorm default bias

    out32 = text_seq_time_embedding(
        text, seq, w_text, b_text, gamma, beta, w_seq, b_seq,
        mxu_dtype=None, out_dtype=jnp.float32,
    )
    out32 = jax.block_until_ready(out32)
    ref32 = _reference(text, seq, w_text, b_text, gamma, beta, w_seq, b_seq)
    assert out32.shape == (B, TIME_DIM)
    assert jnp.allclose(out32, ref32, atol=1e-2, rtol=1e-2), "f32 path mismatch"

    # ---- Case 2: bf16 fast path, forced K-tiling, partial batch tile -------
    B2, D2 = 24, 256
    text2 = jax.random.normal(keys[0], (B2, D2), jnp.float32).astype(jnp.bfloat16)
    seq2 = jax.random.normal(keys[1], (B2, D2), jnp.float32).astype(jnp.bfloat16)
    # Weights converted to bf16 once at "parameter load" time (not per call).
    w_text2 = (jax.random.normal(keys[2], (D2, D2), jnp.float32) * 0.02).astype(jnp.bfloat16)
    w_seq2 = (jax.random.normal(keys[4], (D2, D2), jnp.float32) * 0.02).astype(jnp.bfloat16)
    b_text2 = jax.random.normal(keys[3], (D2,), jnp.float32) * 0.02
    b_seq2 = jax.random.normal(keys[5], (D2,), jnp.float32) * 0.02
    gamma2 = jnp.ones((D2,), jnp.float32)
    beta2 = jnp.zeros((D2,), jnp.float32)

    out16 = text_seq_time_embedding(
        text2, seq2, w_text2, b_text2, gamma2, beta2, w_seq2, b_seq2,
        num_k_steps=2,   # exercise the K-tiled accumulator path
    )
    out16 = jax.block_until_ready(out16)
    ref16 = _reference(text2, seq2, w_text2, b_text2, gamma2, beta2, w_seq2, b_seq2)
    assert out16.shape == (B2, D2) and out16.dtype == jnp.bfloat16
    assert jnp.allclose(out16.astype(jnp.float32), ref16, atol=6e-2, rtol=6e-2), \
        "bf16 path mismatch"

    print("KERNEL_OK")
</pallas_src>

<mosaic_0001>
module attributes {stable_mosaic.version = 11 : i64} {
  func.func @_text_seq_time_kernel(%arg0: i32, %arg1: i32, %arg2: memref<8x128xf32, #tpu.memory_space<vmem>>, %arg3: memref<8x128xf32, #tpu.memory_space<vmem>>, %arg4: memref<128x256xf32, #tpu.memory_space<vmem>>, %arg5: memref<128x256xf32, #tpu.memory_space<vmem>>, %arg6: memref<4x256xf32, #tpu.memory_space<vmem>>, %arg7: memref<8x256xf32, #tpu.memory_space<vmem>>, %arg8: memref<8x256xf32, #tpu.memory_space<vmem>>, %arg9: memref<8x256xf32, #tpu.memory_space<vmem>>) attributes {dimension_semantics = [#tpu.dimension_semantics<parallel>, #tpu.dimension_semantics<arbitrary>], iteration_bounds = array<i64: 1, 1>, scalar_prefetch = 0 : i64, scratch_operands = 2 : i64, tpu.core_type = #tpu.core_type<tc>, window_params = [{transform_indices = @transform_0, window_bounds = array<i64: 8, 128>}, {transform_indices = @transform_1, window_bounds = array<i64: 8, 128>}, {pipeline_mode = #tpu.pipeline_mode<synchronous>, transform_indices = @transform_2, window_bounds = array<i64: 128, 256>}, {pipeline_mode = #tpu.pipeline_mode<synchronous>, transform_indices = @transform_3, window_bounds = array<i64: 128, 256>}, {pipeline_mode = #tpu.pipeline_mode<synchronous>, transform_indices = @transform_4, window_bounds = array<i64: 4, 256>}, {transform_indices = @transform_5, window_bounds = array<i64: 8, 256>}]} {
    %c0_i32 = arith.constant 0 : i32
    %0 = arith.cmpi eq, %arg1, %c0_i32 : i32
    %1 = arith.extui %0 : i1 to i32
    %c0_i32_0 = arith.constant 0 : i32
    %2 = arith.cmpi ne, %1, %c0_i32_0 : i32
    scf.if %2 {
      %cst_19 = arith.constant 0.000000e+00 : f32
      %18 = vector.broadcast %cst_19 : f32 to vector<8x256xf32>
      %c0_20 = arith.constant 0 : index
      %c0_21 = arith.constant 0 : index
      %19 = vector.load %arg8[%c0_20, %c0_21] : memref<8x256xf32, #tpu.memory_space<vmem>>, vector<8x256xf32>
      tpu.vector_store %arg8[%c0_20, %c0_21], %18 {strides = array<i32>} : memref<8x256xf32, #tpu.memory_space<vmem>>, vector<8x256xf32>,
      %cst_22 = arith.constant 0.000000e+00 : f32
      %20 = vector.broadcast %cst_22 : f32 to vector<8x256xf32>
      %c0_23 = arith.constant 0 : index
      %c0_24 = arith.constant 0 : index
      %21 = vector.load %arg9[%c0_23, %c0_24] : memref<8x256xf32, #tpu.memory_space<vmem>>, vector<8x256xf32>
      tpu.vector_store %arg9[%c0_23, %c0_24], %20 {strides = array<i32>} : memref<8x256xf32, #tpu.memory_space<vmem>>, vector<8x256xf32>,
    } else {
    }
    %c0 = arith.constant 0 : index
    %c0_1 = arith.constant 0 : index
    %3 = vector.load %arg2[%c0, %c0_1] : memref<8x128xf32, #tpu.memory_space<vmem>>, vector<8x128xf32>
    %c0_2 = arith.constant 0 : index
    %c0_3 = arith.constant 0 : index
    %4 = vector.load %arg4[%c0_2, %c0_3] : memref<128x256xf32, #tpu.memory_space<vmem>>, vector<128x256xf32>
    %c0_4 = arith.constant 0 : index
    %c0_5 = arith.constant 0 : index
    %5 = vector.load %arg3[%c0_4, %c0_5] : memref<8x128xf32, #tpu.memory_space<vmem>>, vector<8x128xf32>
    %c0_6 = arith.constant 0 : index
    %c0_7 = arith.constant 0 : index
    %6 = vector.load %arg5[%c0_6, %c0_7] : memref<128x256xf32, #tpu.memory_space<vmem>>, vector<128x256xf32>
    %c0_8 = arith.constant 0 : index
    %c0_9 = arith.constant 0 : index
    %7 = vector.load %arg8[%c0_8, %c0_9] : memref<8x256xf32, #tpu.memory_space<vmem>>, vector<8x256xf32>
    %cst = arith.constant dense<0.000000e+00> : vector<8x256xf32>
    %8 = tpu.matmul %3, %4, %cst {dimension_numbers = #tpu.dot_dimension_numbers<[1], [0], [0], [1], [0, 0, 1, 1], [], []>} : vector<8x128xf32>, vector<128x256xf32>, vector<8x256xf32> -> vector<8x256xf32>
    %9 = arith.addf %7, %8 : vector<8x256xf32>
    %c0_10 = arith.constant 0 : index
    %c0_11 = arith.constant 0 : index
    %10 = vector.load %arg8[%c0_10, %c0_11] : memref<8x256xf32, #tpu.memory_space<vmem>>, vector<8x256xf32>
    tpu.vector_store %arg8[%c0_10, %c0_11], %9 {strides = array<i32>} : memref<8x256xf32, #tpu.memory_space<vmem>>, vector<8x256xf32>,
    %c0_12 = arith.constant 0 : index
    %c0_13 = arith.constant 0 : index
    %11 = vector.load %arg9[%c0_12, %c0_13] : memref<8x256xf32, #tpu.memory_space<vmem>>, vector<8x256xf32>
    %cst_14 = arith.constant dense<0.000000e+00> : vector<8x256xf32>
    %12 = tpu.matmul %5, %6, %cst_14 {dimension_numbers = #tpu.dot_dimension_numbers<[1], [0], [0], [1], [0, 0, 1, 1], [], []>} : vector<8x128xf32>, vector<128x256xf32>, vector<8x256xf32> -> vector<8x256xf32>
    %13 = arith.addf %11, %12 : vector<8x256xf32>
    %c0_15 = arith.constant 0 : index
    %c0_16 = arith.constant 0 : index
    %14 = vector.load %arg9[%c0_15, %c0_16] : memref<8x256xf32, #tpu.memory_space<vmem>>, vector<8x256xf32>
    tpu.vector_store %arg9[%c0_15, %c0_16], %13 {strides = array<i32>} : memref<8x256xf32, #tpu.memory_space<vmem>>, vector<8x256xf32>,
    %c0_i32_17 = arith.constant 0 : i32
    %15 = arith.cmpi eq, %arg1, %c0_i32_17 : i32
    %16 = arith.extui %15 : i1 to i32
    %c0_i32_18 = arith.constant 0 : i32
    %17 = arith.cmpi ne, %16, %c0_i32_18 : i32
    scf.if %17 {
      %c0_19 = arith.constant 0 : index
      %c0_20 = arith.constant 0 : index
      %18 = vector.load %arg6[%c0_19, %c0_20] : memref<4x256xf32, #tpu.memory_space<vmem>>, vector<4x256xf32>
      %19 = vector.extract_strided_slice %18 {offsets = [0, 0], sizes = [1, 256], strides = [1, 1]} : vector<4x256xf32> to vector<1x256xf32>
      %20 = vector.extract_strided_slice %18 {offsets = [1, 0], sizes = [1, 256], strides = [1, 1]} : vector<4x256xf32> to vector<1x256xf32>
      %21 = vector.extract_strided_slice %18 {offsets = [2, 0], sizes = [1, 256], strides = [1, 1]} : vector<4x256xf32> to vector<1x256xf32>
      %22 = vector.extract_strided_slice %18 {offsets = [3, 0], sizes = [1, 256], strides = [1, 1]} : vector<4x256xf32> to vector<1x256xf32>
      %c0_21 = arith.constant 0 : index
      %c0_22 = arith.constant 0 : index
      %23 = vector.load %arg8[%c0_21, %c0_22] : memref<8x256xf32, #tpu.memory_space<vmem>>, vector<8x256xf32>
      %24 = vector.broadcast %19 : vector<1x256xf32> to vector<8x256xf32>
      %25 = arith.addf %23, %24 : vector<8x256xf32>
      %cst_23 = arith.constant dense<0.000000e+00> : vector<8xf32>
      %26 = vector.multi_reduction <add>, %25, %cst_23 [1] : vector<8x256xf32> to vector<8xf32>
      %27 = vector.shape_cast %26 : vector<8xf32> to vector<8x1xf32>
      %28 = arith.mulf %25, %25 : vector<8x256xf32>
      %cst_24 = arith.constant dense<0.000000e+00> : vector<8xf32>
      %29 = vector.multi_reduction <add>, %28, %cst_24 [1] : vector<8x256xf32> to vector<8xf32>
      %30 = vector.shape_cast %29 : vector<8xf32> to vector<8x1xf32>
      %cst_25 = arith.constant 3.906250e-03 : f32
      %31 = vector.broadcast %cst_25 : f32 to vector<8x1xf32>
      %32 = arith.mulf %27, %31 : vector<8x1xf32>
      %cst_26 = arith.constant 3.906250e-03 : f32
      %33 = vector.broadcast %cst_26 : f32 to vector<8x1xf32>
      %34 = arith.mulf %30, %33 : vector<8x1xf32>
      %35 = arith.mulf %32, %32 : vector<8x1xf32>
      %36 = arith.subf %34, %35 : vector<8x1xf32>
      %cst_27 = arith.constant 0.000000e+00 : f32
      %37 = vector.broadcast %cst_27 : f32 to vector<8x1xf32>
      %38 = arith.maximumf %36, %37 : vector<8x1xf32>
      %39 = vector.broadcast %32 : vector<8x1xf32> to vector<8x256xf32>
      %40 = arith.subf %25, %39 : vector<8x256xf32>
      %cst_28 = arith.constant 9.99999974E-6 : f32
      %41 = vector.broadcast %cst_28 : f32 to vector<8x1xf32>
      %42 = arith.addf %38, %41 : vector<8x1xf32>
      %43 = math.rsqrt %42 : vector<8x1xf32>
      %44 = vector.broadcast %43 : vector<8x1xf32> to vector<8x256xf32>
      %45 = arith.mulf %40, %44 : vector<8x256xf32>
      %46 = vector.broadcast %20 : vector<1x256xf32> to vector<8x256xf32>
      %47 = arith.mulf %45, %46 : vector<8x256xf32>
      %48 = vector.broadcast %21 : vector<1x256xf32> to vector<8x256xf32>
      %49 = arith.addf %47, %48 : vector<8x256xf32>
      %c0_29 = arith.constant 0 : index
      %c0_30 = arith.constant 0 : index
      %50 = vector.load %arg9[%c0_29, %c0_30] : memref<8x256xf32, #tpu.memory_space<vmem>>, vector<8x256xf32>
      %51 = vector.broadcast %22 : vector<1x256xf32> to vector<8x256xf32>
      %52 = arith.addf %50, %51 : vector<8x256xf32>
      %53 = arith.addf %52, %49 : vector<8x256xf32>
      %c0_31 = arith.constant 0 : index
      %c0_32 = arith.constant 0 : index
      %54 = vector.load %arg7[%c0_31, %c0_32] : memref<8x256xf32, #tpu.memory_space<vmem>>, vector<8x256xf32>
      tpu.vector_store %arg7[%c0_31, %c0_32], %53 {strides = array<i32>} : memref<8x256xf32, #tpu.memory_space<vmem>>, vector<8x256xf32>,
    } else {
    }
    return
  }
  func.func @transform_0(%arg0: i32, %arg1: i32) -> (i32, i32) {
    %c0_i32 = arith.constant 0 : i32
    return %arg0, %arg1 : i32, i32
  }
  func.func @transform_1(%arg0: i32, %arg1: i32) -> (i32, i32) {
    %c0_i32 = arith.constant 0 : i32
    return %arg0, %arg1 : i32, i32
  }
  func.func @transform_2(%arg0: i32, %arg1: i32) -> (i32, i32) {
    %c0_i32 = arith.constant 0 : i32
    %c0_i32_0 = arith.constant 0 : i32
    %c0_i32_1 = arith.constant 0 : i32
    return %c0_i32, %c0_i32_0 : i32, i32
  }
  func.func @transform_3(%arg0: i32, %arg1: i32) -> (i32, i32) {
    %c0_i32 = arith.constant 0 : i32
    %c0_i32_0 = arith.constant 0 : i32
    %c0_i32_1 = arith.constant 0 : i32
    return %c0_i32, %c0_i32_0 : i32, i32
  }
  func.func @transform_4(%arg0: i32, %arg1: i32) -> (i32, i32) {
    %c0_i32 = arith.constant 0 : i32
    %c0_i32_0 = arith.constant 0 : i32
    %c0_i32_1 = arith.constant 0 : i32
    return %c0_i32, %c0_i32_0 : i32, i32
  }
  func.func @transform_5(%arg0: i32, %arg1: i32) -> (i32, i32) {
    %c0_i32 = arith.constant 0 : i32
    %c0_i32_0 = arith.constant 0 : i32
    return %arg0, %c0_i32 : i32, i32
  }
}

</mosaic_0001>

<bundles_post_ra>
// kernel: text_seq_time_embedding.1
= control target key start
LH: loop header
LB: loop body
LE: loop exit
PB: predicated region body
PF: predicated region fallthrough
CT: control target
= control target key end

     0   :  { %10 = vsyncpa [#allocation5], 0  ;;  %s630_s0 = inlined_call_operand.vmem [shape: f32[8,128], index: 0, kind: input, shape index: {}]   ;;  %s631_s1 = inlined_call_operand.vmem [shape: f32[8,128], index: 1, kind: input, shape index: {}]   ;;  %s632_s2 = inlined_call_operand.hbm [shape: f32[128,256], index: 2, kind: input, shape index: {}]   ;;  %s633_s3 = inlined_call_operand.hbm [shape: f32[128,256], index: 3, kind: input, shape index: {}]   ;;  %s634_s4 = inlined_call_operand.vmem [shape: f32[4,256], index: 4, kind: input, shape index: {}]   ;;  %s635_s5 = inlined_call_operand.hbm [shape: f32[8,256], index: 5, kind: output, shape index: {}]  }
   0x1   :  { %11 = vsyncpa [#allocation8], 0 }
   0x2   :  { %12 = vsyncpa [#allocation6], 0  ;;  %s549_s18 = smov [#allocation4]   ;;  %s477_s22 = scalar_lea.hbm %s632_s2, 4096 }
   0x3   :  { %s22_s19 = sshll.u32 %s549_s18, 4  ;;  %p478_p0 = scmp.ne.s32.totalorder %s632_s2, %s477_s22  ;;  %s23_s19 = int_to_ptr.vmem [resolvable:$true] %s22_s19 }
   0x4   :  { %p481_p1 = scmp.lt.u32.totalorder %s477_s22, %s632_s2 }
   0x6   :  { %p483_p2 = pnand %p481_p1, %p478_p0 }
   0x8   :  { %486 = shalt.err (!%p483_p2)
}
   0x9   :  { %s487_s27 = scalar_lea.vmem %s23_s19, 4096  ;;  %p492_p4 = scmp.lt.s32.totalorder %s23_s19, %s23_s19 }
   0xa   :  { %p488_p3 = scmp.ne.s32.totalorder %s23_s19, %s487_s27  ;;  %p493_p5 = scmp.lt.s32.totalorder %s487_s27, %s487_s27 }
   0xc   :  { %p494_p6 = por %p493_p5, %p492_p4 }
   0xe   :  { %p495_p7 = pnand %p494_p6, %p488_p3 }
  0x10   :  { %498 = shalt.err (!%p495_p7)
}
  0x11   :  { %s550_s28 = smov 256   ;;  %s551_s29 = smov 16  }
  0x12   :  { %28 = dma.hbm_to_vmem [thread:$0]  %s632_s2, 4096, %s23_s19, [#allocation5], %s550_s28, %s550_s28, %s551_s29  }
  0x13   :  { %s552_s7 = smov [#allocation7]   ;;  %s499_s11 = scalar_lea.hbm %s633_s3, 4096 }
  0x14   :  { %s34_s8 = sshll.u32 %s552_s7, 4  ;;  %p500_p8 = scmp.ne.s32.totalorder %s633_s3, %s499_s11  ;;  %s35_s8 = int_to_ptr.vmem [resolvable:$true] %s34_s8 }
  0x15   :  { %p503_p9 = scmp.lt.u32.totalorder %s499_s11, %s633_s3 }
  0x17   :  { %p505_p10 = pnand %p503_p9, %p500_p8 }
  0x19   :  { %508 = shalt.err (!%p505_p10)
}
  0x1a   :  { %s509_s16 = scalar_lea.vmem %s35_s8, 4096  ;;  %p514_p12 = scmp.lt.s32.totalorder %s35_s8, %s35_s8 }
  0x1b   :  { %p510_p11 = scmp.ne.s32.totalorder %s35_s8, %s509_s16  ;;  %p515_p13 = scmp.lt.s32.totalorder %s509_s16, %s509_s16 }
  0x1d   :  { %p516_p0 = por %p515_p13, %p514_p12 }
  0x1f   :  { %p517_p1 = pnand %p516_p0, %p510_p11 }
  0x21   :  { %520 = shalt.err (!%p517_p1)
}
  0x22   :  { %40 = dma.hbm_to_vmem [thread:$0]  %s633_s3, 4096, %s35_s8, [#allocation8], %s550_s28, %s550_s28, %s551_s29  }
  0x23   :  { %543 = dma.done.wait [#allocation5], 4096  }
  0x24   :  { %544 = vsyncadd [#allocation5], 4294963200 }
  0x25   :  { %545 = dma.done.wait [#allocation8], 4096  }
  0x26   :  { %546 = vsyncadd [#allocation8], 4294963200  ;;  %v553_v0 = vmov 0.0   ;;  %v59_v1 = vld [vmem:[#allocation4 + $0x8] sm:$0xff]  ;;  %v61_v2 = vld [vmem:[#allocation4 + $0x18] sm:$0xff] }
  0x27   :  { %189 = vmatprep.mubr.f32.mxu0 %v553_v0  ;;  %266 = vmatprep.mubr.f32.mxu1 %v553_v0  ;;  %v58_v3 = vld [vmem:[#allocation4] sm:$0xff]  ;;  %v405_v4 = vpack.c.bf16 %v61_v2, %v59_v1  ;;  %v60_v5 = vld [vmem:[#allocation4 + $0x10] sm:$0xff]  ;;  %v63_v6 = vld [vmem:[#allocation4 + $0x28] sm:$0xff] }
  0x28   :  { %v65_v7 = vld [vmem:[#allocation4 + $0x38] sm:$0xff]  ;;  %v407_v8 = vpack.c.bf16 %v60_v5, %v58_v3  ;;  %v62_v10 = vld [vmem:[#allocation4 + $0x20] sm:$0xff]  ;;  %v64_v11 = vld [vmem:[#allocation4 + $0x30] sm:$0xff] }
  0x29   :  { %v409_v9 = vpack.c.bf16 %v65_v7, %v63_v6  ;;  %v67_v12 = vld [vmem:[#allocation4 + $0x48] sm:$0xff]  ;;  %406 = vmatprep.subr.bf16.mxu0 %v405_v4  ;;  %v69_v13 = vld [vmem:[#allocation4 + $0x58] sm:$0xff]  ;;  %v411_v14 = vpack.c.bf16 %v64_v11, %v62_v10  ;;  %v66_v16 = vld [vmem:[#allocation4 + $0x40] sm:$0xff] }
  0x2a   :  { %408 = vmatpush1.bf16.msra.mxu0 %v407_v8  ;;  %v413_v15 = vpack.c.bf16 %v69_v13, %v67_v12  ;;  %v68_v17 = vld [vmem:[#allocation4 + $0x50] sm:$0xff]  ;;  %v71_v18 = vld [vmem:[#allocation4 + $0x68] sm:$0xff]  ;;  %v73_v19 = vld [vmem:[#allocation4 + $0x78] sm:$0xff] }
  0x2b   :  { %410 = vmatprep.subr.bf16.mxu0 %v409_v9  ;;  %v415_v20 = vpack.c.bf16 %v68_v17, %v66_v16  ;;  %v417_v21 = vpack.c.bf16 %v73_v19, %v71_v18  ;;  %v70_v22 = vld [vmem:[#allocation4 + $0x60] sm:$0xff]  ;;  %v72_v23 = vld [vmem:[#allocation4 + $0x70] sm:$0xff]  ;;  %v75_v24 = vld [vmem:[#allocation4 + $0x88] sm:$0xff] }
  0x2c   :  { %v77_v25 = vld [vmem:[#allocation4 + $0x98] sm:$0xff]  ;;  %v74_v26 = vld [vmem:[#allocation4 + $0x80] sm:$0xff]  ;;  %v76_v27 = vld [vmem:[#allocation4 + $0x90] sm:$0xff]  ;;  %v419_v31 = vpack.c.bf16 %v72_v23, %v70_v22 }
  0x2d   :  { %v92_v28 = vld [vmem:[#allocation7 + $0x8] sm:$0xff]  ;;  %v94_v29 = vld [vmem:[#allocation7 + $0x18] sm:$0xff]  ;;  %v91_v30 = vld [vmem:[#allocation7] sm:$0xff]  ;;  %v421_v36 = vpack.c.bf16 %v77_v25, %v75_v24  ;;  %v423_v46 = vpack.c.bf16 %v76_v27, %v74_v26 }
  0x2e   :  { %412 = vmatpush1.bf16.msra.mxu0 %v411_v14  ;;  %v437_v32 = vpack.c.bf16 %v94_v29, %v92_v28  ;;  %v93_v33 = vld [vmem:[#allocation7 + $0x10] sm:$0xff]  ;;  %v96_v34 = vld [vmem:[#allocation7 + $0x28] sm:$0xff]  ;;  %v98_v35 = vld [vmem:[#allocation7 + $0x38] sm:$0xff] }
  0x2f   :  { %414 = vmatprep.subr.bf16.mxu0 %v413_v15  ;;  %v439_v37 = vpack.c.bf16 %v93_v33, %v91_v30  ;;  %v441_v38 = vpack.c.bf16 %v98_v35, %v96_v34  ;;  %v95_v39 = vld [vmem:[#allocation7 + $0x20] sm:$0xff]  ;;  %v97_v40 = vld [vmem:[#allocation7 + $0x30] sm:$0xff]  ;;  %v100_v41 = vld [vmem:[#allocation7 + $0x48] sm:$0xff]  ;;  %v284_v35 = vlaneseq }
  0x30   :  { %v79_v42 = vld [vmem:[#allocation4 + $0xa8] sm:$0xff]  ;;  %v81_v43 = vld [vmem:[#allocation4 + $0xb8] sm:$0xff]  ;;  %438 = vmatprep.subr.bf16.mxu1 %v437_v32  ;;  %v443_v45 = vpack.c.bf16 %v97_v40, %v95_v39  ;;  %v78_v47 = vld [vmem:[#allocation4 + $0xa0] sm:$0xff] }
  0x31   :  { %v102_v44 = vld [vmem:[#allocation7 + $0x58] sm:$0xff]  ;;  %440 = vmatpush1.bf16.msra.mxu1 %v439_v37  ;;  %v99_v49 = vld [vmem:[#allocation7 + $0x40] sm:$0xff]  ;;  %v101_v50 = vld [vmem:[#allocation7 + $0x50] sm:$0xff]  ;;  %v425_v51 = vpack.c.bf16 %v81_v43, %v79_v42 }
  0x32   :  { %416 = vmatpush1.bf16.msra.mxu0 %v415_v20  ;;  %442 = vmatprep.subr.bf16.mxu1 %v441_v38  ;;  %v445_v48 = vpack.c.bf16 %v102_v44, %v100_v41  ;;  %v80_v52 = vld [vmem:[#allocation4 + $0xb0] sm:$0xff]  ;;  %v104_v53 = vld [vmem:[#allocation7 + $0x68] sm:$0xff]  ;;  %v106_v54 = vld [vmem:[#allocation7 + $0x78] sm:$0xff]  ;;  %v447_v57 = vpack.c.bf16 %v101_v50, %v99_v49 }
  0x33   :  { %418 = vmatprep.subr.bf16.mxu0 %v417_v21  ;;  %v83_v55 = vld [vmem:[#allocation4 + $0xc8] sm:$0xff]  ;;  %v85_v56 = vld [vmem:[#allocation4 + $0xd8] sm:$0xff]  ;;  %v427_v58 = vpack.c.bf16 %v80_v52, %v78_v47  ;;  %v82_v59 = vld [vmem:[#allocation4 + $0xc0] sm:$0xff]  ;;  %v449_v60 = vpack.c.bf16 %v106_v54, %v104_v53 }
  0x34   :  { %v103_v61 = vld [vmem:[#allocation7 + $0x60] sm:$0xff]  ;;  %v105_v62 = vld [vmem:[#allocation7 + $0x70] sm:$0xff]  ;;  %v429_v63 = vpack.c.bf16 %v85_v56, %v83_v55  ;;  %v108_v1 = vld [vmem:[#allocation7 + $0x88] sm:$0xff] }
  0x35   :  { %444 = vmatpush1.bf16.msra.mxu1 %v443_v45  ;;  %v84_v0 = vld [vmem:[#allocation4 + $0xd0] sm:$0xff]  ;;  %v110_v2 = vld [vmem:[#allocation7 + $0x98] sm:$0xff]  ;;  %v87_v3 = vld [vmem:[#allocation4 + $0xe8] sm:$0xff]  ;;  %v451_v5 = vpack.c.bf16 %v105_v62, %v103_v61 }
  0x36   :  { %420 = vmatpush1.bf16.msra.mxu0 %v419_v31  ;;  %446 = vmatprep.subr.bf16.mxu1 %v445_v48  ;;  %v89_v4 = vld [vmem:[#allocation4 + $0xf8] sm:$0xff]  ;;  %v431_v6 = vpack.c.bf16 %v84_v0, %v82_v59  ;;  %v86_v7 = vld [vmem:[#allocation4 + $0xe0] sm:$0xff]  ;;  %v453_v8 = vpack.c.bf16 %v110_v2, %v108_v1  ;;  %v109_v10 = vld [vmem:[#allocation7 + $0x90] sm:$0xff] }
  0x37   :  { %422 = vmatprep.subr.bf16.mxu0 %v421_v36  ;;  %v107_v9 = vld [vmem:[#allocation7 + $0x80] sm:$0xff]  ;;  %v433_v11 = vpack.c.bf16 %v89_v4, %v87_v3  ;;  %v88_v12 = vld [vmem:[#allocation4 + $0xf0] sm:$0xff]  ;;  %v112_v13 = vld [vmem:[#allocation7 + $0xa8] sm:$0xff]  ;;  %v285_v36 = vshrl.u32 %v284_v35, 7 }
  0x38   :  { %v114_v14 = vld [vmem:[#allocation7 + $0xb8] sm:$0xff]  ;;  %v455_v15 = vpack.c.bf16 %v109_v10, %v107_v9  ;;  %v435_v16 = vpack.c.bf16 %v88_v12, %v86_v7  ;;  %v111_v18 = vld [vmem:[#allocation7 + $0xa0] sm:$0xff]  ;;  %v113_v19 = vld [vmem:[#allocation7 + $0xb0] sm:$0xff] }
  0x39   :  { %448 = vmatpush1.bf16.msra.mxu1 %v447_v57  ;;  %v457_v17 = vpack.c.bf16 %v114_v14, %v112_v13  ;;  %v116_v20 = vld [vmem:[#allocation7 + $0xc8] sm:$0xff]  ;;  %v118_v21 = vld [vmem:[#allocation7 + $0xd8] sm:$0xff]  ;;  %v459_v22 = vpack.c.bf16 %v113_v19, %v111_v18  ;;  %v57_v23 = vld [vmem:[%s630_s0] sm:$0xff]  ;;  %v286_v37 = vsub.s32 0, %v285_v36  ;;  %v290_v39 = vsub.s32 4, %v285_v36 }
  0x3a   :  { %424 = vmatpush1.bf16.msra.mxu0 %v423_v46  ;;  %450 = vmatprep.subr.bf16.mxu1 %v449_v60  ;;  %v461_v24 = vpack.c.bf16 %v118_v21, %v116_v20  ;;  %v115_v25 = vld [vmem:[#allocation7 + $0xc0] sm:$0xff]  ;;  %v117_v26 = vld [vmem:[#allocation7 + $0xd0] sm:$0xff]  ;;  %v120_v27 = vld [vmem:[#allocation7 + $0xe8] sm:$0xff]  ;;  %v325_v62 = vsub.s32 1, %v285_v36  ;;  %v367_v0 = vsub.s32 3, %v285_v36  ;;  %v371_v1 = vsub.s32 7, %v285_v36 }
  0x3b   :  { %426 = vmatprep.subr.bf16.mxu0 %v425_v51  ;;  %v122_v28 = vld [vmem:[#allocation7 + $0xf8] sm:$0xff]  ;;  %v463_v29 = vpack.c.bf16 %v117_v26, %v115_v25  ;;  %v119_v31 = vld [vmem:[#allocation7 + $0xe0] sm:$0xff]  ;;  %v121_v32 = vld [vmem:[#allocation7 + $0xf0] sm:$0xff]  ;;  %v345_v2 = vsub.s32 2, %v285_v36  ;;  %v349_v3 = vsub.s32 6, %v285_v36 }
  0x3c   :  { %v465_v30 = vpack.c.bf16 %v122_v28, %v120_v27  ;;  %v467_v33 = vpack.c.bf16 %v121_v32, %v119_v31  ;;  %v90_v34 = vld [vmem:[%s631_s1] sm:$0xff]  ;;  %s554_s1 = smov [#allocation9]  }
  0x3d   :  { %452 = vmatpush1.bf16.msra.mxu1 %v451_v5  ;;  %v280_v38 = vld [vmem:[%s634_s4] sm:$0xff]  ;;  %s395_s4 = sshll.u32 %s554_s1, 4  ;;  %s396_s4 = int_to_ptr.vmem [resolvable:$true] %s395_s4 }
  0x3e   :  { %428 = vmatpush1.bf16.msra.mxu0 %v427_v58  ;;  %454 = vmatprep.subr.bf16.mxu1 %v453_v8  ;;  %v287_v40 = vrot.slane %v280_v38, %v286_v37  ;;  %v291_v41 = vrot.slane %v280_v38, %v290_v39  ;;  %v326_v4 = vrot.slane %v280_v38, %v325_v62  ;;  %s521_s22 = scalar_lea.vmem %s396_s4, 256  ;;  %p526_p3 = scmp.lt.s32.totalorder %s396_s4, %s396_s4 }
  0x3f   :  { %430 = vmatprep.subr.bf16.mxu0 %v429_v63  ;;  %v329_v63 = vsub.s32 5, %v285_v36  ;;  %v372_v7 = vrot.slane %v280_v38, %v371_v1  ;;  %v346_v8 = vrot.slane %v280_v38, %v345_v2  ;;  %v350_v9 = vrot.slane %v280_v38, %v349_v3  ;;  %p522_p2 = scmp.ne.s32.totalorder %s396_s4, %s521_s22  ;;  %p527_p4 = scmp.lt.s32.totalorder %s521_s22, %s521_s22 }
  0x40   :  { %v297_v42 = vrot.slane %v287_v40, %v286_v37  ;;  %v301_v43 = vrot.slane %v291_v41, %v286_v37  ;;  %v336_v10 = vrot.slane %v326_v4, %v325_v62 }
  0x41   :  { %456 = vmatpush1.bf16.msra.mxu1 %v455_v15  ;;  %v330_v5 = vrot.slane %v280_v38, %v329_v63  ;;  %v382_v15 = vrot.slane %v372_v7, %v367_v0  ;;  %v356_v18 = vrot.slane %v346_v8, %v345_v2  ;;  %v360_v20 = vrot.slane %v350_v9, %v345_v2  ;;  %p528_p5 = por %p527_p4, %p526_p3 }
  0x42   :  { %432 = vmatpush1.bf16.msra.mxu0 %v431_v6  ;;  %458 = vmatprep.subr.bf16.mxu1 %v457_v17  ;;  %v368_v6 = vrot.slane %v280_v38, %v367_v0 }
  0x43   :  { %434 = vmatprep.subr.bf16.mxu0 %v433_v11  ;;  %v340_v11 = vrot.slane %v330_v5, %v325_v62  ;;  %p529_p6 = pnand %p528_p5, %p522_p2 }
  0x44   :  { %v378_v14 = vrot.slane %v368_v6, %v367_v0 }
  0x45   :  { %460 = vmatpush1.bf16.msra.mxu1 %v459_v22 }
  0x46   :  { %436 = vmatpush1.bf16.msra.mxu0 %v435_v16  ;;  %462 = vmatprep.subr.bf16.mxu1 %v461_v24 }
  0x49   :  { %190 = vmatmul.mubr.f32.vlgmr.msra.gmra.mrb[0].mxu0 %v57_v23  ;;  %464 = vmatpush1.bf16.msra.mxu1 %v463_v29 }
  0x4a   :  { %466 = vmatprep.subr.bf16.mxu1 %v465_v30 }
  0x4d   :  { %468 = vmatpush1.bf16.msra.mxu1 %v467_v33 }
  0x50   :  { %267 = vmatmul.mubr.f32.vlgmr.msra.gmra.mrb[0].mxu1 %v90_v34 }
 0x11c   :  { %v191_v44 = vpop.f32.mrb[0].mxu0 }
 0x11d   :  { %v302_v45 = vadd.f32 %v297_v42, %v191_v44  ;;  %v193_v46 = vpop.f32.mrb[1].mxu0 }
 0x11e   :  { %v303_v47 = vadd.f32 %v301_v43, %v193_v46 }
 0x11f   :  { %v307_v49 = vmul.f32 %v302_v45, %v302_v45 }
 0x120   :  { %v304_v48 = vadd.f32 %v303_v47, %v302_v45  ;;  %v308_v50 = vmul.f32 %v303_v47, %v303_v47 }
 0x122   :  { %305 = vadd.xlane.f32.xlu0 %v304_v48  ;;  %v309_v51 = vadd.f32 %v308_v50, %v307_v49 }
 0x123   :  { %v268_v52 = vpop.f32.mrb[0].mxu1 }
 0x124   :  { %v270_v53 = vpop.f32.mrb[1].mxu1  ;;  %v383_v22 = vadd.f32 %v378_v14, %v268_v52 }
 0x125   :  { %v384_v24 = vadd.f32 %v382_v15, %v270_v53 }
 0x126   :  { %310 = vadd.xlane.f32.xlu0 %v309_v51 }
 0x1af   :  { %v306_v54 = vpop.xlane.xlu0 %305 }
 0x1b0   :  { %v312_v55 = vmul.f32 0.00390625, %v306_v54 }
 0x1b2   :  { %v314_v57 = vmul.f32 %v312_v55, %v312_v55  ;;  %v317_v12 = vsub.f32 %v302_v45, %v312_v55  ;;  %v318_v13 = vsub.f32 %v303_v47, %v312_v55 }
 0x1b3   :  { %v311_v56 = vpop.xlane.xlu0 %310 }
 0x1b4   :  { %v313_v58 = vmul.f32 0.00390625, %v311_v56 }
 0x1b6   :  { %v315_v59 = vsub.f32 %v313_v58, %v314_v57 }
 0x1b8   :  { %v316_v60 = vmax.f32 %v315_v59, 0.0 }
 0x1ba   :  { %v319_v61 = vadd.f32 1e-05, %v316_v60 }
 0x1bc   :  { %475 = vrsqrt.f32 %v319_v61 }
 0x1c6   :  { %v476_v16 = vpop.eup %475 }
 0x1c7   :  { %v321_v17 = vmul.f32 %v476_v16, %v317_v12  ;;  %v322_v19 = vmul.f32 %v476_v16, %v318_v13 }
 0x1c9   :  { %v341_v21 = vmul.f32 %v336_v10, %v321_v17  ;;  %v342_v23 = vmul.f32 %v340_v11, %v322_v19 }
 0x1cb   :  { %v361_v25 = vadd.f32 %v356_v18, %v341_v21  ;;  %v362_v26 = vadd.f32 %v360_v20, %v342_v23 }
 0x1cd   :  { %v385_v27 = vadd.f32 %v383_v22, %v361_v25  ;;  %v386_v28 = vadd.f32 %v384_v24, %v362_v26 }
 0x1cf   :  { %387 = vst [vmem:[#allocation9] sm:$0xff] %v385_v27  ;;  %388 = vst [vmem:[#allocation9 + $0x8] sm:$0xff] %v386_v28 }
 0x1d0   :  { %532 = shalt.err (!%p529_p6)
}
 0x1d1   :  { %s533_s25 = scalar_lea.hbm %s635_s5, 256 }
 0x1d2   :  { %p534_p7 = scmp.ne.s32.totalorder %s635_s5, %s533_s25  ;;  %p537_p8 = scmp.lt.u32.totalorder %s533_s25, %s635_s5 }
 0x1d4   :  { %p539_p9 = pnand %p537_p8, %p534_p7 }
 0x1d6   :  { %542 = shalt.err (!%p539_p9)
}
 0x1d7   :  { %398 = dma.vmem_to_hbm [thread:$0]  %s396_s4, 256, %s635_s5, [#allocation6]  }
 0x1d8   :  { %547 = dma.done.wait [#allocation6], 256  }
 0x1d9   :  { %548 = vsyncadd [#allocation6], 4294967040 }
 0x1da   :  { %402 = vsyncpa [#allocation5], 1 }
 0x1db   :  { %403 = vsyncpa [#allocation8], 1 }
 0x1dc   :  { %404 = vsyncpa [#allocation6], 1 }

</bundles_post_ra>
